<compile_context>
chip_gen: v7x
topology: tpu7x:2x2x1
jax: 0.10.0
libtpu: 0.0.40
codegen_flags: <defaults>
</compile_context>

<pallas_src>
import jax
import jax.numpy as jnp
from jax.experimental import pallas as pl
from jax.experimental.pallas import tpu as pltpu


def _esilu_kernel(params_ref, x_ref, o_ref):
    # params_ref lives in SMEM: [alpha, beta, gamma] as f32 scalars.
    alpha = params_ref[0]
    beta = params_ref[1]
    gamma = params_ref[2]

    xv = x_ref[...].astype(jnp.float32)
    # sigmoid(z) == 0.5 * (tanh(z / 2) + 1): single EUP push per element.
    sig = 0.5 * (jnp.tanh((0.5 * beta) * xv) + 1.0)
    # Fused: alpha*x*sigmoid(beta*x) + gamma*relu(x) == x*(alpha*sig + gamma*(x>0))
    out = xv * (alpha * sig + gamma * (xv > 0).astype(jnp.float32))
    o_ref[...] = out.astype(o_ref.dtype)


def _esilu_jnp(x, alpha, beta, gamma, out_dtype):
    xf = x.astype(jnp.float32)
    out = alpha * xf * jax.nn.sigmoid(beta * xf) + gamma * jnp.maximum(xf, 0.0)
    return out.astype(out_dtype)


def _choose_tm(rows):
    """Pick a row tile: big (amortizes per-step overhead) but guaranteeing
    >=2 grid steps for mid/large inputs so v7x's two TensorCores both run."""
    tm_target = 8192                       # 8192 x 128 f32 = 4 MiB per block
    if rows <= 1024:
        return rows                        # single full-extent block (always legal)
    half = -(-rows // 2)                   # ceil(rows / 2)
    half = ((half + 255) // 256) * 256     # multiple of 256 (covers f32 & bf16 packing)
    return min(tm_target, half)


def enhanced_silu(x, alpha=1.0, beta=0.5, gamma=0.5):
    """Elementwise Enhanced SiLU on an arbitrarily shaped array."""
    orig_shape = x.shape
    orig_dtype = x.dtype

    params = jnp.asarray([alpha, beta, gamma], dtype=jnp.float32)

    flat = x.reshape(-1)
    n = flat.shape[0]

    lanes = 128
    n_main = (n // lanes) * lanes          # 128-aligned prefix handled by Pallas

    pieces = []
    if n_main > 0:
        rows = n_main // lanes
        x2d = flat[:n_main].reshape(rows, lanes)

        tm = _choose_tm(rows)
        grid = (pl.cdiv(rows, tm),)

        itemsize = jnp.dtype(orig_dtype).itemsize
        cost = pl.CostEstimate(
            flops=6 * n_main,
            transcendentals=n_main,
            bytes_accessed=2 * n_main * itemsize,
        )

        out2d = pl.pallas_call(
            _esilu_kernel,
            out_shape=jax.ShapeDtypeStruct((rows, lanes), orig_dtype),
            grid=grid,
            in_specs=[
                pl.BlockSpec(memory_space=pltpu.MemorySpace.SMEM),   # params (3,)
                pl.BlockSpec((tm, lanes), lambda i: (i, 0)),         # x tile
            ],
            out_specs=pl.BlockSpec((tm, lanes), lambda i: (i, 0)),
            compiler_params=pltpu.CompilerParams(
                dimension_semantics=("parallel",),
                vmem_limit_bytes=32 << 20,
            ),
            cost_estimate=cost,
        )(params, x2d)
        pieces.append(out2d.reshape(-1))

    if n_main < n:
        # <=127-element ragged tail: plain jnp, avoids full-array pad/slice copies.
        tail = flat[n_main:]
        pieces.append(_esilu_jnp(tail, params[0], params[1], params[2], orig_dtype))

    out = pieces[0] if len(pieces) == 1 else jnp.concatenate(pieces)
    return out.reshape(orig_shape)


def enhanced_silu_ref(x, alpha=1.0, beta=0.5, gamma=0.5):
    return alpha * x * jax.nn.sigmoid(beta * x) + gamma * jnp.maximum(x, 0.0)


if __name__ == "__main__":
    key = jax.random.PRNGKey(0)
    alpha, beta, gamma = 1.0, 0.5, 0.5

    # Main case: NCHW input matching typical use of the PyTorch module.
    x = jax.random.normal(key, (2, 4, 16, 16), dtype=jnp.float32)
    out = jax.block_until_ready(enhanced_silu(x, alpha, beta, gamma))
    ref = enhanced_silu_ref(x, alpha, beta, gamma)
    assert out.shape == x.shape and out.dtype == x.dtype
    assert jnp.allclose(out, ref, atol=1e-5, rtol=1e-5)

    # Ragged case: size not a multiple of 128 (exercises main + tail paths).
    k2 = jax.random.PRNGKey(1)
    y = jax.random.normal(k2, (2, 3, 11, 13), dtype=jnp.float32)   # 858 elements
    out2 = jax.block_until_ready(enhanced_silu(y, alpha, beta, gamma))
    ref2 = enhanced_silu_ref(y, alpha, beta, gamma)
    assert out2.shape == y.shape
    assert jnp.allclose(out2, ref2, atol=1e-5, rtol=1e-5)

    # Different learnable-parameter values: same compiled kernel (SMEM params).
    out3 = jax.block_until_ready(enhanced_silu(x, 1.3, 0.7, 0.2))
    ref3 = enhanced_silu_ref(x, 1.3, 0.7, 0.2)
    assert jnp.allclose(out3, ref3, atol=1e-5, rtol=1e-5)

    print("KERNEL_OK")
</pallas_src>

<mosaic_0001>
module attributes {stable_mosaic.version = 11 : i64} {
  func.func @_esilu_kernel(%arg0: i32, %arg1: memref<3xf32, #tpu.memory_space<smem>>, %arg2: memref<16x128xf32, #tpu.memory_space<vmem>>, %arg3: memref<16x128xf32, #tpu.memory_space<vmem>>) attributes {dimension_semantics = [#tpu.dimension_semantics<parallel>], iteration_bounds = array<i64: 1>, scalar_prefetch = 0 : i64, scratch_operands = 0 : i64, tpu.core_type = #tpu.core_type<tc>, window_params = [{transform_indices = @transform_0, window_bounds = array<i64: 3>}, {transform_indices = @transform_1, window_bounds = array<i64: 16, 128>}, {transform_indices = @transform_2, window_bounds = array<i64: 16, 128>}]} {
    %c0 = arith.constant 0 : index
    %0 = memref.load %arg1[%c0] : memref<3xf32, #tpu.memory_space<smem>>
    %c1 = arith.constant 1 : index
    %1 = memref.load %arg1[%c1] : memref<3xf32, #tpu.memory_space<smem>>
    %c2 = arith.constant 2 : index
    %2 = memref.load %arg1[%c2] : memref<3xf32, #tpu.memory_space<smem>>
    %c0_0 = arith.constant 0 : index
    %c0_1 = arith.constant 0 : index
    %3 = vector.load %arg2[%c0_0, %c0_1] : memref<16x128xf32, #tpu.memory_space<vmem>>, vector<16x128xf32>
    %cst = arith.constant 5.000000e-01 : f32
    %4 = arith.mulf %cst, %1 : f32
    %5 = vector.broadcast %4 : f32 to vector<16x128xf32>
    %6 = arith.mulf %5, %3 : vector<16x128xf32>
    %7 = math.tanh %6 : vector<16x128xf32>
    %cst_2 = arith.constant 1.000000e+00 : f32
    %8 = vector.broadcast %cst_2 : f32 to vector<16x128xf32>
    %9 = arith.addf %7, %8 : vector<16x128xf32>
    %cst_3 = arith.constant 5.000000e-01 : f32
    %10 = vector.broadcast %cst_3 : f32 to vector<16x128xf32>
    %11 = arith.mulf %10, %9 : vector<16x128xf32>
    %12 = vector.broadcast %0 : f32 to vector<16x128xf32>
    %13 = arith.mulf %12, %11 : vector<16x128xf32>
    %cst_4 = arith.constant 0.000000e+00 : f32
    %14 = vector.broadcast %cst_4 : f32 to vector<16x128xf32>
    %15 = arith.cmpf ogt, %3, %14 : vector<16x128xf32>
    %16 = arith.extui %15 : vector<16x128xi1> to vector<16x128xi32>
    %17 = arith.sitofp %16 : vector<16x128xi32> to vector<16x128xf32>
    %18 = vector.broadcast %2 : f32 to vector<16x128xf32>
    %19 = arith.mulf %18, %17 : vector<16x128xf32>
    %20 = arith.addf %13, %19 : vector<16x128xf32>
    %21 = arith.mulf %3, %20 : vector<16x128xf32>
    %c0_5 = arith.constant 0 : index
    %c0_6 = arith.constant 0 : index
    %22 = vector.load %arg3[%c0_5, %c0_6] : memref<16x128xf32, #tpu.memory_space<vmem>>, vector<16x128xf32>
    tpu.vector_store %arg3[%c0_5, %c0_6], %21 {strides = array<i32>} : memref<16x128xf32, #tpu.memory_space<vmem>>, vector<16x128xf32>,
    return
  }
  func.func @transform_0(%arg0: i32) -> i32 {
    %c0_i32 = arith.constant 0 : i32
    %c0_i32_0 = arith.constant 0 : i32
    return %c0_i32 : i32
  }
  func.func @transform_1(%arg0: i32) -> (i32, i32) {
    %c0_i32 = arith.constant 0 : i32
    %c0_i32_0 = arith.constant 0 : i32
    return %arg0, %c0_i32 : i32, i32
  }
  func.func @transform_2(%arg0: i32) -> (i32, i32) {
    %c0_i32 = arith.constant 0 : i32
    %c0_i32_0 = arith.constant 0 : i32
    return %arg0, %c0_i32 : i32, i32
  }
}

</mosaic_0001>

<bundles_post_ra>
// kernel: tpu_custom_call.1
= control target key start
LH: loop header
LB: loop body
LE: loop exit
PB: predicated region body
PF: predicated region fallthrough
CT: control target
= control target key end

     0   :  { %7 = vsyncpa [#allocation5], 0  ;;  %s225_s0 = inlined_call_operand.hbm [shape: f32[3], index: 0, kind: input, shape index: {}]   ;;  %s226_s1 = inlined_call_operand.hbm [shape: f32[16,128], index: 1, kind: input, shape index: {}]   ;;  %s227_s2 = inlined_call_operand.hbm [shape: f32[16,128], index: 2, kind: output, shape index: {}]  }
   0x1   :  { %8 = vsyncpa [#allocation3], 0 }
   0x2   :  { %9 = vsyncpa [#allocation4], 0  ;;  %s102_s11 = scalar_lea.hbm %s225_s0, 16 }
   0x3   :  { %p103_p0 = scmp.ne.s32.totalorder %s225_s0, %s102_s11  ;;  %p106_p1 = scmp.lt.u32.totalorder %s102_s11, %s225_s0 }
   0x5   :  { %p108_p2 = pnand %p106_p1, %p103_p0 }
   0x7   :  { %111 = shalt.err (!%p108_p2)
}
   0x8   :  { %s162_s16 = smov [#allocation2]   ;;  %s163_s19 = smov [#allocation6]  }
   0x9   :  { %17 = dma.hbm_to_smem %s225_s0, 16, %s162_s16, [#allocation5]  }
   0xa   :  { %s23_s20 = sshll.u32 %s163_s19, 4  ;;  %s112_s23 = scalar_lea.hbm %s226_s1, 256  ;;  %s24_s20 = int_to_ptr.vmem [resolvable:$true] %s23_s20 }
   0xb   :  { %p113_p3 = scmp.ne.s32.totalorder %s226_s1, %s112_s23  ;;  %p116_p4 = scmp.lt.u32.totalorder %s112_s23, %s226_s1 }
   0xd   :  { %p118_p5 = pnand %p116_p4, %p113_p3 }
   0xf   :  { %121 = shalt.err (!%p118_p5)
}
  0x10   :  { %s122_s28 = scalar_lea.vmem %s24_s20, 256  ;;  %p127_p7 = scmp.lt.s32.totalorder %s24_s20, %s24_s20 }
  0x11   :  { %p123_p6 = scmp.ne.s32.totalorder %s24_s20, %s122_s28  ;;  %p128_p8 = scmp.lt.s32.totalorder %s122_s28, %s122_s28 }
  0x13   :  { %p129_p9 = por %p128_p8, %p127_p7 }
  0x15   :  { %p130_p10 = pnand %p129_p9, %p123_p6 }
  0x17   :  { %133 = shalt.err (!%p130_p10)
}
  0x18   :  { %s164_s0 = smov 128   ;;  %s165_s29 = smov 8  }
  0x19   :  { %29 = dma.hbm_to_vmem [thread:$0]  %s226_s1, 256, %s24_s20, [#allocation3], %s164_s0, %s164_s0, %s165_s29  }
  0x1a   :  { %156 = dma.done.wait [#allocation5], 16  }
  0x1b   :  { %157 = vsyncadd [#allocation5], 4294967280 }
  0x1c   :  { %158 = dma.done.wait [#allocation3], 256  }
  0x1d   :  { %159 = vsyncadd [#allocation3], 4294967040 }
  0x1e   :  { %36 = sfence }
  0x1f   :  { %s88_s4 = sld [smem:[#allocation2 + $0x1]]  ;;  %v40_v0 = vld [vmem:[#allocation6] sm:$0xff]  ;;  %v41_v1 = vld [vmem:[#allocation6 + $0x8] sm:$0xff]  ;;  %s89_s6 = sld [smem:[#allocation2 + $0x2]]  ;;  %v166_v6 = vmov 0.0  }
  0x20   :  { %s37_s7 = sld [smem:[#allocation2]]  ;;  %vm55_vm0 = vcmp.gt.f32.partialorder %v40_v0, 0.0  ;;  %vm56_vm1 = vcmp.gt.f32.partialorder %v41_v1, 0.0  ;;  %s167_s1 = smov [#allocation7]  }
  0x21   :  { %v90_v7 = vsel %vm55_vm0, 1.0, %v166_v6  ;;  %v91_v11 = vsel %vm56_vm1, 1.0, %v166_v6  ;;  %s75_s8 = sshll.u32 %s167_s1, 4  ;;  %s76_s8 = int_to_ptr.vmem [resolvable:$true] %s75_s8 }
  0x22   :  { %s134_s9 = scalar_lea.vmem %s76_s8, 256  ;;  %p139_p12 = scmp.lt.s32.totalorder %s76_s8, %s76_s8 }
  0x23   :  { %p135_p11 = scmp.ne.s32.totalorder %s76_s8, %s134_s9  ;;  %p140_p13 = scmp.lt.s32.totalorder %s134_s9, %s134_s9 }
  0x25   :  { %s42_s5 = smul.f32 0.5, %s88_s4  ;;  %v61_v8 = vstv %s89_s6  ;;  %p141_p0 = por %p140_p13, %p139_p12 }
  0x26   :  { %v52_v12 = vstv %s37_s7  ;;  %v62_v15 = vmul.f32 %v90_v7, %v61_v8  ;;  %v63_v17 = vmul.f32 %v91_v11, %v61_v8 }
  0x27   :  { %v43_v2 = vstv %s42_s5  ;;  %p142_p1 = pnand %p141_p0, %p135_p11 }
  0x28   :  { %v44_v3 = vmul.f32 %v43_v2, %v40_v0  ;;  %v45_v4 = vmul.f32 %v43_v2, %v41_v1 }
  0x2a   :  { %98 = vtanh.f32 %v44_v3 }
  0x2b   :  { %100 = vtanh.f32 %v45_v4 }
  0x34   :  { %v99_v5 = vpop.eup %98 }
  0x35   :  { %v101_v9 = vpop.eup %100  ;;  %v48_v10 = vadd.f32 1.0, %v99_v5 }
  0x36   :  { %v49_v13 = vadd.f32 1.0, %v101_v9 }
  0x37   :  { %v50_v14 = vmul.f32 0.5, %v48_v10 }
  0x38   :  { %v51_v16 = vmul.f32 0.5, %v49_v13 }
  0x39   :  { %v53_v18 = vmul.f32 %v52_v12, %v50_v14 }
  0x3a   :  { %v54_v19 = vmul.f32 %v52_v12, %v51_v16 }
  0x3b   :  { %v64_v20 = vadd.f32 %v62_v15, %v53_v18 }
  0x3c   :  { %v65_v21 = vadd.f32 %v63_v17, %v54_v19 }
  0x3d   :  { %v66_v22 = vmul.f32 %v64_v20, %v40_v0 }
  0x3e   :  { %v67_v23 = vmul.f32 %v65_v21, %v41_v1 }
  0x3f   :  { %68 = vst [vmem:[#allocation7] sm:$0xff] %v66_v22 }
  0x40   :  { %69 = vst [vmem:[#allocation7 + $0x8] sm:$0xff] %v67_v23 }
  0x41   :  { %145 = shalt.err (!%p142_p1)
}
  0x42   :  { %s146_s12 = scalar_lea.hbm %s227_s2, 256 }
  0x43   :  { %p147_p2 = scmp.ne.s32.totalorder %s227_s2, %s146_s12  ;;  %p150_p3 = scmp.lt.u32.totalorder %s146_s12, %s227_s2 }
  0x45   :  { %p152_p4 = pnand %p150_p3, %p147_p2 }
  0x47   :  { %155 = shalt.err (!%p152_p4)
}
  0x48   :  { %81 = dma.vmem_to_hbm [thread:$0]  %s76_s8, 256, %s227_s2, [#allocation4], %s164_s0, %s164_s0, %s165_s29  }
  0x49   :  { %160 = dma.done.wait [#allocation4], 256  }
  0x4a   :  { %161 = vsyncadd [#allocation4], 4294967040 }
  0x4b   :  { %85 = vsyncpa [#allocation3], 1 }
  0x4c   :  { %86 = vsyncpa [#allocation4], 1 }
  0x4d   :  { %87 = vsyncpa [#allocation5], 1 }

</bundles_post_ra>
